<compile_context>
chip_gen: v5e
topology: v5e:2x2
jax: 0.10.0
libtpu: 0.0.40
codegen_flags: <defaults>
</compile_context>

<pallas_src>
import functools

import jax
import jax.numpy as jnp
from jax.experimental import pallas as pl
from jax.experimental.pallas import tpu as pltpu


# --------------------------------------------------------------------------
# Weight preprocessing (paid ONCE at __init__, outside any kernel)
# --------------------------------------------------------------------------
def _prep_packed(w, S, A, *, apply_log_softmax, row_dup=False):
    """torch-layout weight (rows, S) -> exp-space, a-packed lane layout.

    Lane layout:  lane = slab*128 + g*S + t   with  a = slab*G + g,  G = 128 // S.
    Returns (ew (S, n_slab*128) float32, mw (1, S) float32) where
      ew[s, lane(a,t)] = exp(W3[s, a, t] - mw[t]),  mw[t] = max_{s,a} W3[s, a, t].
    """
    if apply_log_softmax:
        w = jax.nn.log_softmax(w, axis=1)
    if row_dup:
        # transCombine rows are indexed by (i, j), i over S//2 pair-states.
        # Duplicating i -> s = 2i, 2i+1 folds doCombine's x pair-logsumexp into
        # the matmul K dimension (ex[2i] + ex[2i+1] hit the same weight row).
        S2 = S // 2
        w3 = w.reshape(S2, A, S)
        mw = jnp.max(w3, axis=(0, 1))
        ew = jnp.exp(w3 - mw[None, None, :])
        ew = jnp.repeat(ew, 2, axis=0)                      # (S, A, S)
    else:
        w3 = w.reshape(S, A, S)
        mw = jnp.max(w3, axis=(0, 1))
        ew = jnp.exp(w3 - mw[None, None, :])
    G = 128 // S
    n_slab = -(-A // G)
    pad_a = n_slab * G - A
    if pad_a:
        ew = jnp.pad(ew, ((0, 0), (0, pad_a), (0, 0)))
    ew = ew.reshape(S, n_slab * G * S)                      # a-major, then t
    return ew.astype(jnp.float32), mw[None, :].astype(jnp.float32)


# --------------------------------------------------------------------------
# Fused kernel: addRight + addLeft + addPair + doCombine for a block of rows
# --------------------------------------------------------------------------
def _fused_kernel(x_ref, y_ref, n4_ref, n16_ref, w_ref, mw_ref, o_ref, *, S):
    x = x_ref[...]           # (M, S)   state log-probs
    y = y_ref[...]           # (M, S)   combine partner log-probs
    n4 = n4_ref[...]         # (M, 4)   single-nucleotide log-probs
    n16 = n16_ref[...]       # (M, 16)  pair-nucleotide log-probs
    w = w_ref[...]           # (S, L)   bf16 exp-space packed weights (resident)
    mw = mw_ref[...]         # (1, 4S)  per-output-column max removed from w

    neg_inf = jnp.float32(-jnp.inf)

    def safe_rowmax(a):
        m = jnp.max(a, axis=-1, keepdims=True)
        # all--inf rows (DP init/masking): shift by 0 -> ex = 0 -> out = -inf, no NaN
        return jnp.where(m > neg_inf, m, 0.0)

    # Row maxes / exp factors computed ONCE per block (shared by all four ops).
    mx = safe_rowmax(x)
    my = safe_rowmax(y)
    m4 = safe_rowmax(n4)
    m16 = safe_rowmax(n16)

    ex = jnp.exp(x - mx).astype(w.dtype)     # (M, S)  values in [0,1], bf16 for MXU
    ey = jnp.exp(y - my)                     # (M, S)  f32 epilogue scales
    e4 = jnp.exp(n4 - m4)                    # (M, 4)
    e16 = jnp.exp(n16 - m16)                 # (M, 16)

    # Single MXU matmul for all four ops.
    v = jnp.dot(ex, w, preferred_element_type=jnp.float32)   # (M, L) f32

    G = 128 // S                      # packed `a` values per 128-lane slab

    def tree_sum(terms):              # break the serial accumulator chain
        while len(terms) > 1:
            nxt = [terms[i] + terms[i + 1] for i in range(0, len(terms) - 1, 2)]
            if len(terms) % 2:
                nxt.append(terms[-1])
            terms = nxt
        return terms[0]

    def op_acc(base_lane, scales):
        terms = []
        for a, sc in enumerate(scales):
            off = base_lane + (a // G) * 128 + (a % G) * S
            terms.append(sc * v[:, off:off + S])
        return tree_sum(terms)

    sc4 = [e4[:, a:a + 1] for a in range(4)]
    sc16 = [e16[:, a:a + 1] for a in range(16)]
    # y pair fold in exp space: ey2[:, j] = ey[:, 2j] + ey[:, 2j+1]
    scC = [ey[:, 2 * j:2 * j + 1] + ey[:, 2 * j + 1:2 * j + 2] for j in range(S // 2)]

    n_slab4 = -(-4 // G)
    n_slab16 = -(-16 // G)
    base_R = 0
    base_L = base_R + n_slab4 * 128
    base_P = base_L + n_slab4 * 128
    base_C = base_P + n_slab16 * 128

    acc_R = op_acc(base_R, sc4)       # (M, S) each
    acc_L = op_acc(base_L, sc4)
    acc_P = op_acc(base_P, sc16)
    acc_C = op_acc(base_C, scC)

    # Pack the four results into ONE lane-dense (M, 4S) slab; single log / store.
    acc = jnp.concatenate([acc_R, acc_L, acc_P, acc_C], axis=1)
    mn = jnp.concatenate([
        jnp.broadcast_to(m4, acc_R.shape),
        jnp.broadcast_to(m4, acc_L.shape),
        jnp.broadcast_to(m16, acc_P.shape),
        jnp.broadcast_to(my, acc_C.shape),
    ], axis=1)

    o_ref[...] = mx + mn + mw + jnp.log(acc)


# --------------------------------------------------------------------------
# Module
# --------------------------------------------------------------------------
class TransitionModelPallas:
    """Deterministically-initialized JAX/Pallas port of TransitionModel."""

    def __init__(self, Nstate, key):
        assert 128 % Nstate == 0 and Nstate % 2 == 0, "Nstate must divide 128 and be even"
        k1, k2, k3, k4 = jax.random.split(key, 4)
        self.Nstate = Nstate
        self.Nstate2 = Nstate // 2
        self.divider = Nstate // self.Nstate2

        # torch.rand -> uniform [0, 1)   (raw parameters, kept for reference checks)
        self.transRight = jax.random.uniform(k1, (Nstate * 4, Nstate), jnp.float32)
        self.transLeft = jax.random.uniform(k2, (Nstate * 4, Nstate), jnp.float32)
        self.transPair = jax.random.uniform(k3, (Nstate * 4 * 4, Nstate), jnp.float32)
        self.transCombine = jax.random.uniform(
            k4, (self.Nstate2 * self.Nstate2, Nstate), jnp.float32)

        # Hoisted weight preprocessing: log_softmax / col-max / exp / a-packing,
        # then ONE concatenated bf16 weight matrix for the single fused matmul.
        S = Nstate
        wR, mwR = _prep_packed(self.transRight, S, 4, apply_log_softmax=True)
        wL, mwL = _prep_packed(self.transLeft, S, 4, apply_log_softmax=True)
        wP, mwP = _prep_packed(self.transPair, S, 16, apply_log_softmax=False)
        wC, mwC = _prep_packed(self.transCombine, S, self.Nstate2,
                               apply_log_softmax=True, row_dup=True)
        self._Wbig = jnp.concatenate([wR, wL, wP, wC], axis=1).astype(jnp.bfloat16)
        self._mw_all = jnp.concatenate([mwR, mwL, mwP, mwC], axis=1)   # (1, 4S) f32
        self._calls = {}

    # ---- pallas_call construction (cached + jitted per padded row count) ----
    def _get_call(self, Np):
        if Np in self._calls:
            return self._calls[Np]
        S = self.Nstate
        lanes = self._Wbig.shape[1]
        Mblk = 128 if Np % 128 == 0 else 8           # M-stacked blocks when possible
        call = pl.pallas_call(
            functools.partial(_fused_kernel, S=S),
            grid=(Np // Mblk,),
            in_specs=[
                pl.BlockSpec((Mblk, S), lambda i: (i, 0)),      # x rows (streamed)
                pl.BlockSpec((Mblk, S), lambda i: (i, 0)),      # y rows
                pl.BlockSpec((Mblk, 4), lambda i: (i, 0)),      # nuc4 rows
                pl.BlockSpec((Mblk, 16), lambda i: (i, 0)),     # nuc16 rows
                pl.BlockSpec((S, lanes), lambda i: (0, 0)),     # Wbig: VMEM-resident
                pl.BlockSpec((1, 4 * S), lambda i: (0, 0)),     # mw:   VMEM-resident
            ],
            out_specs=pl.BlockSpec((Mblk, 4 * S), lambda i: (i, 0)),
            out_shape=jax.ShapeDtypeStruct((Np, 4 * S), jnp.float32),
            compiler_params=pltpu.CompilerParams(
                dimension_semantics=("parallel",)),   # 2 TCs on v7x split row blocks
        )
        jitted = jax.jit(call)
        self._calls[Np] = jitted
        return jitted

    def _run_fused(self, x, y, n4, n16):
        """x,y: (N,S); n4: (N,4); n16: (N,16) -> packed (N, 4S) [R|L|P|C]."""
        N = x.shape[0]
        Np = ((N + 7) // 8) * 8
        if Np != N:
            pad = ((0, Np - N), (0, 0))
            x, y, n4, n16 = (jnp.pad(a, pad) for a in (x, y, n4, n16))
        out = self._get_call(Np)(x, y, n4, n16, self._Wbig, self._mw_all)
        return out[:N]

    # ---- forward: identity --------------------------------------------------
    def forward(self, x):
        # TODO(synk): PyTorch forward also does a host-side print('hi'); omitted so
        # the script's only success output is "KERNEL_OK".
        return x

    # ---- hot path: all four ops, many positions, one gridded pallas_call ----
    def step_all_positions(self, xs, ys, nuc4s, nuc16s):
        """xs/ys: (P,B,S), nuc4s: (P,B,4), nuc16s: (P,B,16).

        Positions x batch are flattened into the matmul M dimension (128-row
        blocks); weights stay VMEM-resident across the whole grid."""
        P, B, S = xs.shape
        out = self._run_fused(xs.reshape(P * B, S), ys.reshape(P * B, S),
                              nuc4s.reshape(P * B, 4), nuc16s.reshape(P * B, 16))
        out = out.reshape(P, B, 4 * S)
        return (out[..., 0:S], out[..., S:2 * S], out[..., 2 * S:3 * S], out[..., 3 * S:4 * S])

    # ---- one position, all four ops, one pallas_call -------------------------
    def step_all(self, x, y, nuc4, nuc16):
        S = self.Nstate
        out = self._run_fused(x, y, nuc4, nuc16)
        return out[:, 0:S], out[:, S:2 * S], out[:, 2 * S:3 * S], out[:, 3 * S:4 * S]

    # ---- single-op wrappers (testing only; hot path should use step_all*) ----
    def addRight(self, x, nucVector):
        S, B = self.Nstate, x.shape[0]
        out = self._run_fused(x, jnp.zeros_like(x), nucVector,
                              jnp.zeros((B, 16), jnp.float32))
        return out[:, 0:S]

    def addLeft(self, x, nucVector):
        S, B = self.Nstate, x.shape[0]
        out = self._run_fused(x, jnp.zeros_like(x), nucVector,
                              jnp.zeros((B, 16), jnp.float32))
        return out[:, S:2 * S]

    def addPair(self, x, nucVector):
        S, B = self.Nstate, x.shape[0]
        out = self._run_fused(x, jnp.zeros_like(x),
                              jnp.zeros((B, 4), jnp.float32), nucVector)
        return out[:, 2 * S:3 * S]

    def doCombine(self, x, y):
        S, B = self.Nstate, x.shape[0]
        out = self._run_fused(x, y, jnp.zeros((B, 4), jnp.float32),
                              jnp.zeros((B, 16), jnp.float32))
        return out[:, 3 * S:4 * S]

    # TODO(synk): fastCombine / quickOverestimateCombiine (3-D batched variants) are
    # not ported; they are not exercised by this module's 2-D hot path.


# --------------------------------------------------------------------------
# Pure-JAX references (mirror the PyTorch code literally) for verification
# --------------------------------------------------------------------------
def _ref_add(x, nuc, w, apply_ls):
    if apply_ls:
        w = jax.nn.log_softmax(w, axis=1)
    t = (x[:, :, None] + nuc[:, None, :]).reshape(x.shape[0], -1)
    return jax.scipy.special.logsumexp(t[:, :, None] + w[None, :, :], axis=1)


def _ref_combine(x, y, w):
    B = x.shape[0]
    x2 = jax.scipy.special.logsumexp(x.reshape(B, x.shape[1] // 2, 2), axis=2)
    y2 = jax.scipy.special.logsumexp(y.reshape(B, y.shape[1] // 2, 2), axis=2)
    t = (x2[:, :, None] + y2[:, None, :]).reshape(B, -1)
    m = jax.nn.log_softmax(w, axis=1)
    return jax.scipy.special.logsumexp(t[:, :, None] + m[None, :, :], axis=1)


# --------------------------------------------------------------------------
if __name__ == "__main__":
    Nstate, B, P = 32, 8, 32
    key = jax.random.PRNGKey(0)
    k_model, kx, ky, k4, k16, kxs, kys, k4s, k16s = jax.random.split(key, 9)

    model = TransitionModelPallas(Nstate, k_model)

    x = jax.random.normal(kx, (B, Nstate), jnp.float32)
    y = jax.random.normal(ky, (B, Nstate), jnp.float32)
    nuc4 = jax.nn.log_softmax(jax.random.normal(k4, (B, 4), jnp.float32), axis=1)
    nuc16 = jax.nn.log_softmax(jax.random.normal(k16, (B, 16), jnp.float32), axis=1)

    # forward (identity, no kernel launch)
    out_fwd = jax.block_until_ready(model.forward(x))
    assert jnp.allclose(out_fwd, x, atol=1e-6), "forward identity mismatch"

    # Tolerance covers the bf16 MXU path (exp-space weights/activations in [0,1]);
    # algorithmic errors would be O(1).
    tol = dict(atol=2e-2, rtol=2e-2)

    ref_r = _ref_add(x, nuc4, model.transRight, True)
    ref_l = _ref_add(x, nuc4, model.transLeft, True)
    ref_p = _ref_add(x, nuc16, model.transPair, False)
    ref_c = _ref_combine(x, y, model.transCombine)

    # individual methods (testing path; each is one fused pallas_call)
    r = jax.block_until_ready(model.addRight(x, nuc4))
    l = jax.block_until_ready(model.addLeft(x, nuc4))
    p = jax.block_until_ready(model.addPair(x, nuc16))
    c = jax.block_until_ready(model.doCombine(x, y))
    assert jnp.allclose(r, ref_r, **tol), "addRight mismatch"
    assert jnp.allclose(l, ref_l, **tol), "addLeft mismatch"
    assert jnp.allclose(p, ref_p, **tol), "addPair mismatch"
    assert jnp.allclose(c, ref_c, **tol), "doCombine mismatch"

    # fused single-position step (one pallas_call for all four ops)
    fr, fl, fp, fc = jax.block_until_ready(model.step_all(x, y, nuc4, nuc16))
    assert jnp.allclose(fr, ref_r, **tol), "fused addRight mismatch"
    assert jnp.allclose(fl, ref_l, **tol), "fused addLeft mismatch"
    assert jnp.allclose(fp, ref_p, **tol), "fused addPair mismatch"
    assert jnp.allclose(fc, ref_c, **tol), "fused doCombine mismatch"

    # gridded hot path: P positions stacked into the matmul M dimension,
    # weights VMEM-resident across the grid, row-block axis "parallel".
    xs = jax.random.normal(kxs, (P, B, Nstate), jnp.float32)
    ys = jax.random.normal(kys, (P, B, Nstate), jnp.float32)
    nuc4s = jax.nn.log_softmax(jax.random.normal(k4s, (P, B, 4), jnp.float32), axis=-1)
    nuc16s = jax.nn.log_softmax(jax.random.normal(k16s, (P, B, 16), jnp.float32), axis=-1)
    gr, gl, gp, gc = jax.block_until_ready(
        model.step_all_positions(xs, ys, nuc4s, nuc16s))

    xf, yf = xs.reshape(P * B, Nstate), ys.reshape(P * B, Nstate)
    n4f, n16f = nuc4s.reshape(P * B, 4), nuc16s.reshape(P * B, 16)
    assert jnp.allclose(gr.reshape(P * B, -1), _ref_add(xf, n4f, model.transRight, True), **tol), \
        "gridded addRight mismatch"
    assert jnp.allclose(gl.reshape(P * B, -1), _ref_add(xf, n4f, model.transLeft, True), **tol), \
        "gridded addLeft mismatch"
    assert jnp.allclose(gp.reshape(P * B, -1), _ref_add(xf, n16f, model.transPair, False), **tol), \
        "gridded addPair mismatch"
    assert jnp.allclose(gc.reshape(P * B, -1), _ref_combine(xf, yf, model.transCombine), **tol), \
        "gridded doCombine mismatch"

    print("KERNEL_OK")
</pallas_src>

<mosaic_0001>
module attributes {stable_mosaic.version = 11 : i64} {
  func.func @_fused_kernel(%arg0: i32, %arg1: memref<8x32xf32, #tpu.memory_space<vmem>>, %arg2: memref<8x32xf32, #tpu.memory_space<vmem>>, %arg3: memref<8x4xf32, #tpu.memory_space<vmem>>, %arg4: memref<8x16xf32, #tpu.memory_space<vmem>>, %arg5: memref<32x1280xbf16, #tpu.memory_space<vmem>>, %arg6: memref<1x128xf32, #tpu.memory_space<vmem>>, %arg7: memref<8x128xf32, #tpu.memory_space<vmem>>) attributes {dimension_semantics = [#tpu.dimension_semantics<parallel>], iteration_bounds = array<i64: 1>, scalar_prefetch = 0 : i64, scratch_operands = 0 : i64, tpu.core_type = #tpu.core_type<tc>, window_params = [{transform_indices = @transform_0, window_bounds = array<i64: 8, 32>}, {transform_indices = @transform_1, window_bounds = array<i64: 8, 32>}, {transform_indices = @transform_2, window_bounds = array<i64: 8, 4>}, {transform_indices = @transform_3, window_bounds = array<i64: 8, 16>}, {pipeline_mode = #tpu.pipeline_mode<synchronous>, transform_indices = @transform_4, window_bounds = array<i64: 32, 1280>}, {pipeline_mode = #tpu.pipeline_mode<synchronous>, transform_indices = @transform_5, window_bounds = array<i64: 1, 128>}, {transform_indices = @transform_6, window_bounds = array<i64: 8, 128>}]} {
    %c0 = arith.constant 0 : index
    %c0_0 = arith.constant 0 : index
    %0 = vector.load %arg1[%c0, %c0_0] : memref<8x32xf32, #tpu.memory_space<vmem>>, vector<8x32xf32>
    %c0_1 = arith.constant 0 : index
    %c0_2 = arith.constant 0 : index
    %1 = vector.load %arg2[%c0_1, %c0_2] : memref<8x32xf32, #tpu.memory_space<vmem>>, vector<8x32xf32>
    %c0_3 = arith.constant 0 : index
    %c0_4 = arith.constant 0 : index
    %2 = vector.load %arg3[%c0_3, %c0_4] : memref<8x4xf32, #tpu.memory_space<vmem>>, vector<8x4xf32>
    %c0_5 = arith.constant 0 : index
    %c0_6 = arith.constant 0 : index
    %3 = vector.load %arg4[%c0_5, %c0_6] : memref<8x16xf32, #tpu.memory_space<vmem>>, vector<8x16xf32>
    %c0_7 = arith.constant 0 : index
    %c0_8 = arith.constant 0 : index
    %4 = vector.load %arg5[%c0_7, %c0_8] : memref<32x1280xbf16, #tpu.memory_space<vmem>>, vector<32x1280xbf16>
    %c0_9 = arith.constant 0 : index
    %c0_10 = arith.constant 0 : index
    %5 = vector.load %arg6[%c0_9, %c0_10] : memref<1x128xf32, #tpu.memory_space<vmem>>, vector<1x128xf32>
    %cst = arith.constant dense<0xFF800000> : vector<8xf32>
    %6 = vector.multi_reduction <maximumf>, %0, %cst [1] : vector<8x32xf32> to vector<8xf32>
    %7 = vector.shape_cast %6 : vector<8xf32> to vector<8x1xf32>
    %cst_11 = arith.constant 0xFF800000 : f32
    %8 = vector.broadcast %cst_11 : f32 to vector<8x1xf32>
    %9 = arith.cmpf ogt, %7, %8 : vector<8x1xf32>
    %cst_12 = arith.constant 0.000000e+00 : f32
    %10 = vector.broadcast %cst_12 : f32 to vector<8x1xf32>
    %11 = arith.select %9, %7, %10 : vector<8x1xi1>, vector<8x1xf32>
    %cst_13 = arith.constant dense<0xFF800000> : vector<8xf32>
    %12 = vector.multi_reduction <maximumf>, %1, %cst_13 [1] : vector<8x32xf32> to vector<8xf32>
    %13 = vector.shape_cast %12 : vector<8xf32> to vector<8x1xf32>
    %cst_14 = arith.constant 0xFF800000 : f32
    %14 = vector.broadcast %cst_14 : f32 to vector<8x1xf32>
    %15 = arith.cmpf ogt, %13, %14 : vector<8x1xf32>
    %cst_15 = arith.constant 0.000000e+00 : f32
    %16 = vector.broadcast %cst_15 : f32 to vector<8x1xf32>
    %17 = arith.select %15, %13, %16 : vector<8x1xi1>, vector<8x1xf32>
    %cst_16 = arith.constant dense<0xFF800000> : vector<8xf32>
    %18 = vector.multi_reduction <maximumf>, %2, %cst_16 [1] : vector<8x4xf32> to vector<8xf32>
    %19 = vector.shape_cast %18 : vector<8xf32> to vector<8x1xf32>
    %cst_17 = arith.constant 0xFF800000 : f32
    %20 = vector.broadcast %cst_17 : f32 to vector<8x1xf32>
    %21 = arith.cmpf ogt, %19, %20 : vector<8x1xf32>
    %cst_18 = arith.constant 0.000000e+00 : f32
    %22 = vector.broadcast %cst_18 : f32 to vector<8x1xf32>
    %23 = arith.select %21, %19, %22 : vector<8x1xi1>, vector<8x1xf32>
    %cst_19 = arith.constant dense<0xFF800000> : vector<8xf32>
    %24 = vector.multi_reduction <maximumf>, %3, %cst_19 [1] : vector<8x16xf32> to vector<8xf32>
    %25 = vector.shape_cast %24 : vector<8xf32> to vector<8x1xf32>
    %cst_20 = arith.constant 0xFF800000 : f32
    %26 = vector.broadcast %cst_20 : f32 to vector<8x1xf32>
    %27 = arith.cmpf ogt, %25, %26 : vector<8x1xf32>
    %cst_21 = arith.constant 0.000000e+00 : f32
    %28 = vector.broadcast %cst_21 : f32 to vector<8x1xf32>
    %29 = arith.select %27, %25, %28 : vector<8x1xi1>, vector<8x1xf32>
    %30 = vector.broadcast %11 : vector<8x1xf32> to vector<8x32xf32>
    %31 = arith.subf %0, %30 : vector<8x32xf32>
    %32 = math.exp %31 : vector<8x32xf32>
    %33 = arith.truncf %32 : vector<8x32xf32> to vector<8x32xbf16>
    %34 = vector.broadcast %17 : vector<8x1xf32> to vector<8x32xf32>
    %35 = arith.subf %1, %34 : vector<8x32xf32>
    %36 = math.exp %35 : vector<8x32xf32>
    %37 = vector.broadcast %23 : vector<8x1xf32> to vector<8x4xf32>
    %38 = arith.subf %2, %37 : vector<8x4xf32>
    %39 = math.exp %38 : vector<8x4xf32>
    %40 = vector.broadcast %29 : vector<8x1xf32> to vector<8x16xf32>
    %41 = arith.subf %3, %40 : vector<8x16xf32>
    %42 = math.exp %41 : vector<8x16xf32>
    %cst_22 = arith.constant dense<0.000000e+00> : vector<8x1280xf32>
    %43 = tpu.matmul %33, %4, %cst_22 {dimension_numbers = #tpu.dot_dimension_numbers<[1], [0], [0], [1], [0, 0, 1, 1], [], []>} : vector<8x32xbf16>, vector<32x1280xbf16>, vector<8x1280xf32> -> vector<8x1280xf32>
    %44 = vector.extract_strided_slice %39 {offsets = [0, 0], sizes = [8, 1], strides = [1, 1]} : vector<8x4xf32> to vector<8x1xf32>
    %45 = vector.extract_strided_slice %39 {offsets = [0, 1], sizes = [8, 1], strides = [1, 1]} : vector<8x4xf32> to vector<8x1xf32>
    %46 = vector.extract_strided_slice %39 {offsets = [0, 2], sizes = [8, 1], strides = [1, 1]} : vector<8x4xf32> to vector<8x1xf32>
    %47 = vector.extract_strided_slice %39 {offsets = [0, 3], sizes = [8, 1], strides = [1, 1]} : vector<8x4xf32> to vector<8x1xf32>
    %48 = vector.extract_strided_slice %42 {offsets = [0, 0], sizes = [8, 1], strides = [1, 1]} : vector<8x16xf32> to vector<8x1xf32>
    %49 = vector.extract_strided_slice %42 {offsets = [0, 1], sizes = [8, 1], strides = [1, 1]} : vector<8x16xf32> to vector<8x1xf32>
    %50 = vector.extract_strided_slice %42 {offsets = [0, 2], sizes = [8, 1], strides = [1, 1]} : vector<8x16xf32> to vector<8x1xf32>
    %51 = vector.extract_strided_slice %42 {offsets = [0, 3], sizes = [8, 1], strides = [1, 1]} : vector<8x16xf32> to vector<8x1xf32>
    %52 = vector.extract_strided_slice %42 {offsets = [0, 4], sizes = [8, 1], strides = [1, 1]} : vector<8x16xf32> to vector<8x1xf32>
    %53 = vector.extract_strided_slice %42 {offsets = [0, 5], sizes = [8, 1], strides = [1, 1]} : vector<8x16xf32> to vector<8x1xf32>
    %54 = vector.extract_strided_slice %42 {offsets = [0, 6], sizes = [8, 1], strides = [1, 1]} : vector<8x16xf32> to vector<8x1xf32>
    %55 = vector.extract_strided_slice %42 {offsets = [0, 7], sizes = [8, 1], strides = [1, 1]} : vector<8x16xf32> to vector<8x1xf32>
    %56 = vector.extract_strided_slice %42 {offsets = [0, 8], sizes = [8, 1], strides = [1, 1]} : vector<8x16xf32> to vector<8x1xf32>
    %57 = vector.extract_strided_slice %42 {offsets = [0, 9], sizes = [8, 1], strides = [1, 1]} : vector<8x16xf32> to vector<8x1xf32>
    %58 = vector.extract_strided_slice %42 {offsets = [0, 10], sizes = [8, 1], strides = [1, 1]} : vector<8x16xf32> to vector<8x1xf32>
    %59 = vector.extract_strided_slice %42 {offsets = [0, 11], sizes = [8, 1], strides = [1, 1]} : vector<8x16xf32> to vector<8x1xf32>
    %60 = vector.extract_strided_slice %42 {offsets = [0, 12], sizes = [8, 1], strides = [1, 1]} : vector<8x16xf32> to vector<8x1xf32>
    %61 = vector.extract_strided_slice %42 {offsets = [0, 13], sizes = [8, 1], strides = [1, 1]} : vector<8x16xf32> to vector<8x1xf32>
    %62 = vector.extract_strided_slice %42 {offsets = [0, 14], sizes = [8, 1], strides = [1, 1]} : vector<8x16xf32> to vector<8x1xf32>
    %63 = vector.extract_strided_slice %42 {offsets = [0, 15], sizes = [8, 1], strides = [1, 1]} : vector<8x16xf32> to vector<8x1xf32>
    %64 = vector.extract_strided_slice %36 {offsets = [0, 0], sizes = [8, 1], strides = [1, 1]} : vector<8x32xf32> to vector<8x1xf32>
    %65 = vector.extract_strided_slice %36 {offsets = [0, 1], sizes = [8, 1], strides = [1, 1]} : vector<8x32xf32> to vector<8x1xf32>
    %66 = arith.addf %64, %65 : vector<8x1xf32>
    %67 = vector.extract_strided_slice %36 {offsets = [0, 2], sizes = [8, 1], strides = [1, 1]} : vector<8x32xf32> to vector<8x1xf32>
    %68 = vector.extract_strided_slice %36 {offsets = [0, 3], sizes = [8, 1], strides = [1, 1]} : vector<8x32xf32> to vector<8x1xf32>
    %69 = arith.addf %67, %68 : vector<8x1xf32>
    %70 = vector.extract_strided_slice %36 {offsets = [0, 4], sizes = [8, 1], strides = [1, 1]} : vector<8x32xf32> to vector<8x1xf32>
    %71 = vector.extract_strided_slice %36 {offsets = [0, 5], sizes = [8, 1], strides = [1, 1]} : vector<8x32xf32> to vector<8x1xf32>
    %72 = arith.addf %70, %71 : vector<8x1xf32>
    %73 = vector.extract_strided_slice %36 {offsets = [0, 6], sizes = [8, 1], strides = [1, 1]} : vector<8x32xf32> to vector<8x1xf32>
    %74 = vector.extract_strided_slice %36 {offsets = [0, 7], sizes = [8, 1], strides = [1, 1]} : vector<8x32xf32> to vector<8x1xf32>
    %75 = arith.addf %73, %74 : vector<8x1xf32>
    %76 = vector.extract_strided_slice %36 {offsets = [0, 8], sizes = [8, 1], strides = [1, 1]} : vector<8x32xf32> to vector<8x1xf32>
    %77 = vector.extract_strided_slice %36 {offsets = [0, 9], sizes = [8, 1], strides = [1, 1]} : vector<8x32xf32> to vector<8x1xf32>
    %78 = arith.addf %76, %77 : vector<8x1xf32>
    %79 = vector.extract_strided_slice %36 {offsets = [0, 10], sizes = [8, 1], strides = [1, 1]} : vector<8x32xf32> to vector<8x1xf32>
    %80 = vector.extract_strided_slice %36 {offsets = [0, 11], sizes = [8, 1], strides = [1, 1]} : vector<8x32xf32> to vector<8x1xf32>
    %81 = arith.addf %79, %80 : vector<8x1xf32>
    %82 = vector.extract_strided_slice %36 {offsets = [0, 12], sizes = [8, 1], strides = [1, 1]} : vector<8x32xf32> to vector<8x1xf32>
    %83 = vector.extract_strided_slice %36 {offsets = [0, 13], sizes = [8, 1], strides = [1, 1]} : vector<8x32xf32> to vector<8x1xf32>
    %84 = arith.addf %82, %83 : vector<8x1xf32>
    %85 = vector.extract_strided_slice %36 {offsets = [0, 14], sizes = [8, 1], strides = [1, 1]} : vector<8x32xf32> to vector<8x1xf32>
    %86 = vector.extract_strided_slice %36 {offsets = [0, 15], sizes = [8, 1], strides = [1, 1]} : vector<8x32xf32> to vector<8x1xf32>
    %87 = arith.addf %85, %86 : vector<8x1xf32>
    %88 = vector.extract_strided_slice %36 {offsets = [0, 16], sizes = [8, 1], strides = [1, 1]} : vector<8x32xf32> to vector<8x1xf32>
    %89 = vector.extract_strided_slice %36 {offsets = [0, 17], sizes = [8, 1], strides = [1, 1]} : vector<8x32xf32> to vector<8x1xf32>
    %90 = arith.addf %88, %89 : vector<8x1xf32>
    %91 = vector.extract_strided_slice %36 {offsets = [0, 18], sizes = [8, 1], strides = [1, 1]} : vector<8x32xf32> to vector<8x1xf32>
    %92 = vector.extract_strided_slice %36 {offsets = [0, 19], sizes = [8, 1], strides = [1, 1]} : vector<8x32xf32> to vector<8x1xf32>
    %93 = arith.addf %91, %92 : vector<8x1xf32>
    %94 = vector.extract_strided_slice %36 {offsets = [0, 20], sizes = [8, 1], strides = [1, 1]} : vector<8x32xf32> to vector<8x1xf32>
    %95 = vector.extract_strided_slice %36 {offsets = [0, 21], sizes = [8, 1], strides = [1, 1]} : vector<8x32xf32> to vector<8x1xf32>
    %96 = arith.addf %94, %95 : vector<8x1xf32>
    %97 = vector.extract_strided_slice %36 {offsets = [0, 22], sizes = [8, 1], strides = [1, 1]} : vector<8x32xf32> to vector<8x1xf32>
    %98 = vector.extract_strided_slice %36 {offsets = [0, 23], sizes = [8, 1], strides = [1, 1]} : vector<8x32xf32> to vector<8x1xf32>
    %99 = arith.addf %97, %98 : vector<8x1xf32>
    %100 = vector.extract_strided_slice %36 {offsets = [0, 24], sizes = [8, 1], strides = [1, 1]} : vector<8x32xf32> to vector<8x1xf32>
    %101 = vector.extract_strided_slice %36 {offsets = [0, 25], sizes = [8, 1], strides = [1, 1]} : vector<8x32xf32> to vector<8x1xf32>
    %102 = arith.addf %100, %101 : vector<8x1xf32>
    %103 = vector.extract_strided_slice %36 {offsets = [0, 26], sizes = [8, 1], strides = [1, 1]} : vector<8x32xf32> to vector<8x1xf32>
    %104 = vector.extract_strided_slice %36 {offsets = [0, 27], sizes = [8, 1], strides = [1, 1]} : vector<8x32xf32> to vector<8x1xf32>
    %105 = arith.addf %103, %104 : vector<8x1xf32>
    %106 = vector.extract_strided_slice %36 {offsets = [0, 28], sizes = [8, 1], strides = [1, 1]} : vector<8x32xf32> to vector<8x1xf32>
    %107 = vector.extract_strided_slice %36 {offsets = [0, 29], sizes = [8, 1], strides = [1, 1]} : vector<8x32xf32> to vector<8x1xf32>
    %108 = arith.addf %106, %107 : vector<8x1xf32>
    %109 = vector.extract_strided_slice %36 {offsets = [0, 30], sizes = [8, 1], strides = [1, 1]} : vector<8x32xf32> to vector<8x1xf32>
    %110 = vector.extract_strided_slice %36 {offsets = [0, 31], sizes = [8, 1], strides = [1, 1]} : vector<8x32xf32> to vector<8x1xf32>
    %111 = arith.addf %109, %110 : vector<8x1xf32>
    %112 = vector.extract_strided_slice %43 {offsets = [0, 0], sizes = [8, 32], strides = [1, 1]} : vector<8x1280xf32> to vector<8x32xf32>
    %113 = vector.broadcast %44 : vector<8x1xf32> to vector<8x32xf32>
    %114 = arith.mulf %113, %112 : vector<8x32xf32>
    %115 = vector.extract_strided_slice %43 {offsets = [0, 32], sizes = [8, 32], strides = [1, 1]} : vector<8x1280xf32> to vector<8x32xf32>
    %116 = vector.broadcast %45 : vector<8x1xf32> to vector<8x32xf32>
    %117 = arith.mulf %116, %115 : vector<8x32xf32>
    %118 = vector.extract_strided_slice %43 {offsets = [0, 64], sizes = [8, 32], strides = [1, 1]} : vector<8x1280xf32> to vector<8x32xf32>
    %119 = vector.broadcast %46 : vector<8x1xf32> to vector<8x32xf32>
    %120 = arith.mulf %119, %118 : vector<8x32xf32>
    %121 = vector.extract_strided_slice %43 {offsets = [0, 96], sizes = [8, 32], strides = [1, 1]} : vector<8x1280xf32> to vector<8x32xf32>
    %122 = vector.broadcast %47 : vector<8x1xf32> to vector<8x32xf32>
    %123 = arith.mulf %122, %121 : vector<8x32xf32>
    %124 = arith.addf %114, %117 : vector<8x32xf32>
    %125 = arith.addf %120, %123 : vector<8x32xf32>
    %126 = arith.addf %124, %125 : vector<8x32xf32>
    %127 = vector.extract_strided_slice %43 {offsets = [0, 128], sizes = [8, 32], strides = [1, 1]} : vector<8x1280xf32> to vector<8x32xf32>
    %128 = vector.broadcast %44 : vector<8x1xf32> to vector<8x32xf32>
    %129 = arith.mulf %128, %127 : vector<8x32xf32>
    %130 = vector.extract_strided_slice %43 {offsets = [0, 160], sizes = [8, 32], strides = [1, 1]} : vector<8x1280xf32> to vector<8x32xf32>
    %131 = vector.broadcast %45 : vector<8x1xf32> to vector<8x32xf32>
    %132 = arith.mulf %131, %130 : vector<8x32xf32>
    %133 = vector.extract_strided_slice %43 {offsets = [0, 192], sizes = [8, 32], strides = [1, 1]} : vector<8x1280xf32> to vector<8x32xf32>
    %134 = vector.broadcast %46 : vector<8x1xf32> to vector<8x32xf32>
    %135 = arith.mulf %134, %133 : vector<8x32xf32>
    %136 = vector.extract_strided_slice %43 {offsets = [0, 224], sizes = [8, 32], strides = [1, 1]} : vector<8x1280xf32> to vector<8x32xf32>
    %137 = vector.broadcast %47 : vector<8x1xf32> to vector<8x32xf32>
    %138 = arith.mulf %137, %136 : vector<8x32xf32>
    %139 = arith.addf %129, %132 : vector<8x32xf32>
    %140 = arith.addf %135, %138 : vector<8x32xf32>
    %141 = arith.addf %139, %140 : vector<8x32xf32>
    %142 = vector.extract_strided_slice %43 {offsets = [0, 256], sizes = [8, 32], strides = [1, 1]} : vector<8x1280xf32> to vector<8x32xf32>
    %143 = vector.broadcast %48 : vector<8x1xf32> to vector<8x32xf32>
    %144 = arith.mulf %143, %142 : vector<8x32xf32>
    %145 = vector.extract_strided_slice %43 {offsets = [0, 288], sizes = [8, 32], strides = [1, 1]} : vector<8x1280xf32> to vector<8x32xf32>
    %146 = vector.broadcast %49 : vector<8x1xf32> to vector<8x32xf32>
    %147 = arith.mulf %146, %145 : vector<8x32xf32>
    %148 = vector.extract_strided_slice %43 {offsets = [0, 320], sizes = [8, 32], strides = [1, 1]} : vector<8x1280xf32> to vector<8x32xf32>
    %149 = vector.broadcast %50 : vector<8x1xf32> to vector<8x32xf32>
    %150 = arith.mulf %149, %148 : vector<8x32xf32>
    %151 = vector.extract_strided_slice %43 {offsets = [0, 352], sizes = [8, 32], strides = [1, 1]} : vector<8x1280xf32> to vector<8x32xf32>
    %152 = vector.broadcast %51 : vector<8x1xf32> to vector<8x32xf32>
    %153 = arith.mulf %152, %151 : vector<8x32xf32>
    %154 = vector.extract_strided_slice %43 {offsets = [0, 384], sizes = [8, 32], strides = [1, 1]} : vector<8x1280xf32> to vector<8x32xf32>
    %155 = vector.broadcast %52 : vector<8x1xf32> to vector<8x32xf32>
    %156 = arith.mulf %155, %154 : vector<8x32xf32>
    %157 = vector.extract_strided_slice %43 {offsets = [0, 416], sizes = [8, 32], strides = [1, 1]} : vector<8x1280xf32> to vector<8x32xf32>
    %158 = vector.broadcast %53 : vector<8x1xf32> to vector<8x32xf32>
    %159 = arith.mulf %158, %157 : vector<8x32xf32>
    %160 = vector.extract_strided_slice %43 {offsets = [0, 448], sizes = [8, 32], strides = [1, 1]} : vector<8x1280xf32> to vector<8x32xf32>
    %161 = vector.broadcast %54 : vector<8x1xf32> to vector<8x32xf32>
    %162 = arith.mulf %161, %160 : vector<8x32xf32>
    %163 = vector.extract_strided_slice %43 {offsets = [0, 480], sizes = [8, 32], strides = [1, 1]} : vector<8x1280xf32> to vector<8x32xf32>
    %164 = vector.broadcast %55 : vector<8x1xf32> to vector<8x32xf32>
    %165 = arith.mulf %164, %163 : vector<8x32xf32>
    %166 = vector.extract_strided_slice %43 {offsets = [0, 512], sizes = [8, 32], strides = [1, 1]} : vector<8x1280xf32> to vector<8x32xf32>
    %167 = vector.broadcast %56 : vector<8x1xf32> to vector<8x32xf32>
    %168 = arith.mulf %167, %166 : vector<8x32xf32>
    %169 = vector.extract_strided_slice %43 {offsets = [0, 544], sizes = [8, 32], strides = [1, 1]} : vector<8x1280xf32> to vector<8x32xf32>
    %170 = vector.broadcast %57 : vector<8x1xf32> to vector<8x32xf32>
    %171 = arith.mulf %170, %169 : vector<8x32xf32>
    %172 = vector.extract_strided_slice %43 {offsets = [0, 576], sizes = [8, 32], strides = [1, 1]} : vector<8x1280xf32> to vector<8x32xf32>
    %173 = vector.broadcast %58 : vector<8x1xf32> to vector<8x32xf32>
    %174 = arith.mulf %173, %172 : vector<8x32xf32>
    %175 = vector.extract_strided_slice %43 {offsets = [0, 608], sizes = [8, 32], strides = [1, 1]} : vector<8x1280xf32> to vector<8x32xf32>
    %176 = vector.broadcast %59 : vector<8x1xf32> to vector<8x32xf32>
    %177 = arith.mulf %176, %175 : vector<8x32xf32>
    %178 = vector.extract_strided_slice %43 {offsets = [0, 640], sizes = [8, 32], strides = [1, 1]} : vector<8x1280xf32> to vector<8x32xf32>
    %179 = vector.broadcast %60 : vector<8x1xf32> to vector<8x32xf32>
    %180 = arith.mulf %179, %178 : vector<8x32xf32>
    %181 = vector.extract_strided_slice %43 {offsets = [0, 672], sizes = [8, 32], strides = [1, 1]} : vector<8x1280xf32> to vector<8x32xf32>
    %182 = vector.broadcast %61 : vector<8x1xf32> to vector<8x32xf32>
    %183 = arith.mulf %182, %181 : vector<8x32xf32>
    %184 = vector.extract_strided_slice %43 {offsets = [0, 704], sizes = [8, 32], strides = [1, 1]} : vector<8x1280xf32> to vector<8x32xf32>
    %185 = vector.broadcast %62 : vector<8x1xf32> to vector<8x32xf32>
    %186 = arith.mulf %185, %184 : vector<8x32xf32>
    %187 = vector.extract_strided_slice %43 {offsets = [0, 736], sizes = [8, 32], strides = [1, 1]} : vector<8x1280xf32> to vector<8x32xf32>
    %188 = vector.broadcast %63 : vector<8x1xf32> to vector<8x32xf32>
    %189 = arith.mulf %188, %187 : vector<8x32xf32>
    %190 = arith.addf %144, %147 : vector<8x32xf32>
    %191 = arith.addf %150, %153 : vector<8x32xf32>
    %192 = arith.addf %156, %159 : vector<8x32xf32>
    %193 = arith.addf %162, %165 : vector<8x32xf32>
    %194 = arith.addf %168, %171 : vector<8x32xf32>
    %195 = arith.addf %174, %177 : vector<8x32xf32>
    %196 = arith.addf %180, %183 : vector<8x32xf32>
    %197 = arith.addf %186, %189 : vector<8x32xf32>
    %198 = arith.addf %190, %191 : vector<8x32xf32>
    %199 = arith.addf %192, %193 : vector<8x32xf32>
    %200 = arith.addf %194, %195 : vector<8x32xf32>
    %201 = arith.addf %196, %197 : vector<8x32xf32>
    %202 = arith.addf %198, %199 : vector<8x32xf32>
    %203 = arith.addf %200, %201 : vector<8x32xf32>
    %204 = arith.addf %202, %203 : vector<8x32xf32>
    %205 = vector.extract_strided_slice %43 {offsets = [0, 768], sizes = [8, 32], strides = [1, 1]} : vector<8x1280xf32> to vector<8x32xf32>
    %206 = vector.broadcast %66 : vector<8x1xf32> to vector<8x32xf32>
    %207 = arith.mulf %206, %205 : vector<8x32xf32>
    %208 = vector.extract_strided_slice %43 {offsets = [0, 800], sizes = [8, 32], strides = [1, 1]} : vector<8x1280xf32> to vector<8x32xf32>
    %209 = vector.broadcast %69 : vector<8x1xf32> to vector<8x32xf32>
    %210 = arith.mulf %209, %208 : vector<8x32xf32>
    %211 = vector.extract_strided_slice %43 {offsets = [0, 832], sizes = [8, 32], strides = [1, 1]} : vector<8x1280xf32> to vector<8x32xf32>
    %212 = vector.broadcast %72 : vector<8x1xf32> to vector<8x32xf32>
    %213 = arith.mulf %212, %211 : vector<8x32xf32>
    %214 = vector.extract_strided_slice %43 {offsets = [0, 864], sizes = [8, 32], strides = [1, 1]} : vector<8x1280xf32> to vector<8x32xf32>
    %215 = vector.broadcast %75 : vector<8x1xf32> to vector<8x32xf32>
    %216 = arith.mulf %215, %214 : vector<8x32xf32>
    %217 = vector.extract_strided_slice %43 {offsets = [0, 896], sizes = [8, 32], strides = [1, 1]} : vector<8x1280xf32> to vector<8x32xf32>
    %218 = vector.broadcast %78 : vector<8x1xf32> to vector<8x32xf32>
    %219 = arith.mulf %218, %217 : vector<8x32xf32>
    %220 = vector.extract_strided_slice %43 {offsets = [0, 928], sizes = [8, 32], strides = [1, 1]} : vector<8x1280xf32> to vector<8x32xf32>
    %221 = vector.broadcast %81 : vector<8x1xf32> to vector<8x32xf32>
    %222 = arith.mulf %221, %220 : vector<8x32xf32>
    %223 = vector.extract_strided_slice %43 {offsets = [0, 960], sizes = [8, 32], strides = [1, 1]} : vector<8x1280xf32> to vector<8x32xf32>
    %224 = vector.broadcast %84 : vector<8x1xf32> to vector<8x32xf32>
    %225 = arith.mulf %224, %223 : vector<8x32xf32>
    %226 = vector.extract_strided_slice %43 {offsets = [0, 992], sizes = [8, 32], strides = [1, 1]} : vector<8x1280xf32> to vector<8x32xf32>
    %227 = vector.broadcast %87 : vector<8x1xf32> to vector<8x32xf32>
    %228 = arith.mulf %227, %226 : vector<8x32xf32>
    %229 = vector.extract_strided_slice %43 {offsets = [0, 1024], sizes = [8, 32], strides = [1, 1]} : vector<8x1280xf32> to vector<8x32xf32>
    %230 = vector.broadcast %90 : vector<8x1xf32> to vector<8x32xf32>
    %231 = arith.mulf %230, %229 : vector<8x32xf32>
    %232 = vector.extract_strided_slice %43 {offsets = [0, 1056], sizes = [8, 32], strides = [1, 1]} : vector<8x1280xf32> to vector<8x32xf32>
    %233 = vector.broadcast %93 : vector<8x1xf32> to vector<8x32xf32>
    %234 = arith.mulf %233, %232 : vector<8x32xf32>
    %235 = vector.extract_strided_slice %43 {offsets = [0, 1088], sizes = [8, 32], strides = [1, 1]} : vector<8x1280xf32> to vector<8x32xf32>
    %236 = vector.broadcast %96 : vector<8x1xf32> to vector<8x32xf32>
    %237 = arith.mulf %236, %235 : vector<8x32xf32>
    %238 = vector.extract_strided_slice %43 {offsets = [0, 1120], sizes = [8, 32], strides = [1, 1]} : vector<8x1280xf32> to vector<8x32xf32>
    %239 = vector.broadcast %99 : vector<8x1xf32> to vector<8x32xf32>
    %240 = arith.mulf %239, %238 : vector<8x32xf32>
    %241 = vector.extract_strided_slice %43 {offsets = [0, 1152], sizes = [8, 32], strides = [1, 1]} : vector<8x1280xf32> to vector<8x32xf32>
    %242 = vector.broadcast %102 : vector<8x1xf32> to vector<8x32xf32>
    %243 = arith.mulf %242, %241 : vector<8x32xf32>
    %244 = vector.extract_strided_slice %43 {offsets = [0, 1184], sizes = [8, 32], strides = [1, 1]} : vector<8x1280xf32> to vector<8x32xf32>
    %245 = vector.broadcast %105 : vector<8x1xf32> to vector<8x32xf32>
    %246 = arith.mulf %245, %244 : vector<8x32xf32>
    %247 = vector.extract_strided_slice %43 {offsets = [0, 1216], sizes = [8, 32], strides = [1, 1]} : vector<8x1280xf32> to vector<8x32xf32>
    %248 = vector.broadcast %108 : vector<8x1xf32> to vector<8x32xf32>
    %249 = arith.mulf %248, %247 : vector<8x32xf32>
    %250 = vector.extract_strided_slice %43 {offsets = [0, 1248], sizes = [8, 32], strides = [1, 1]} : vector<8x1280xf32> to vector<8x32xf32>
    %251 = vector.broadcast %111 : vector<8x1xf32> to vector<8x32xf32>
    %252 = arith.mulf %251, %250 : vector<8x32xf32>
    %253 = arith.addf %207, %210 : vector<8x32xf32>
    %254 = arith.addf %213, %216 : vector<8x32xf32>
    %255 = arith.addf %219, %222 : vector<8x32xf32>
    %256 = arith.addf %225, %228 : vector<8x32xf32>
    %257 = arith.addf %231, %234 : vector<8x32xf32>
    %258 = arith.addf %237, %240 : vector<8x32xf32>
    %259 = arith.addf %243, %246 : vector<8x32xf32>
    %260 = arith.addf %249, %252 : vector<8x32xf32>
    %261 = arith.addf %253, %254 : vector<8x32xf32>
    %262 = arith.addf %255, %256 : vector<8x32xf32>
    %263 = arith.addf %257, %258 : vector<8x32xf32>
    %264 = arith.addf %259, %260 : vector<8x32xf32>
    %265 = arith.addf %261, %262 : vector<8x32xf32>
    %266 = arith.addf %263, %264 : vector<8x32xf32>
    %267 = arith.addf %265, %266 : vector<8x32xf32>
    %268 = tpu.concatenate %126, %141, %204, %267 in 1 : vector<8x32xf32>, vector<8x32xf32>, vector<8x32xf32>, vector<8x32xf32> -> vector<8x128xf32>
    %269 = vector.shape_cast %23 : vector<8x1xf32> to vector<8x1xf32>
    %270 = vector.broadcast %269 : vector<8x1xf32> to vector<8x32xf32>
    %271 = vector.shape_cast %23 : vector<8x1xf32> to vector<8x1xf32>
    %272 = vector.broadcast %271 : vector<8x1xf32> to vector<8x32xf32>
    %273 = vector.shape_cast %29 : vector<8x1xf32> to vector<8x1xf32>
    %274 = vector.broadcast %273 : vector<8x1xf32> to vector<8x32xf32>
    %275 = vector.shape_cast %17 : vector<8x1xf32> to vector<8x1xf32>
    %276 = vector.broadcast %275 : vector<8x1xf32> to vector<8x32xf32>
    %277 = tpu.concatenate %270, %272, %274, %276 in 1 : vector<8x32xf32>, vector<8x32xf32>, vector<8x32xf32>, vector<8x32xf32> -> vector<8x128xf32>
    %278 = vector.broadcast %11 : vector<8x1xf32> to vector<8x128xf32>
    %279 = arith.addf %278, %277 : vector<8x128xf32>
    %280 = vector.broadcast %5 : vector<1x128xf32> to vector<8x128xf32>
    %281 = arith.addf %279, %280 : vector<8x128xf32>
    %282 = math.log %268 : vector<8x128xf32>
    %283 = arith.addf %281, %282 : vector<8x128xf32>
    %c0_23 = arith.constant 0 : index
    %c0_24 = arith.constant 0 : index
    %284 = vector.load %arg7[%c0_23, %c0_24] : memref<8x128xf32, #tpu.memory_space<vmem>>, vector<8x128xf32>
    tpu.vector_store %arg7[%c0_23, %c0_24], %283 {strides = array<i32>} : memref<8x128xf32, #tpu.memory_space<vmem>>, vector<8x128xf32>,
    return
  }
  func.func @transform_0(%arg0: i32) -> (i32, i32) {
    %c0_i32 = arith.constant 0 : i32
    %c0_i32_0 = arith.constant 0 : i32
    return %arg0, %c0_i32 : i32, i32
  }
  func.func @transform_1(%arg0: i32) -> (i32, i32) {
    %c0_i32 = arith.constant 0 : i32
    %c0_i32_0 = arith.constant 0 : i32
    return %arg0, %c0_i32 : i32, i32
  }
  func.func @transform_2(%arg0: i32) -> (i32, i32) {
    %c0_i32 = arith.constant 0 : i32
    %c0_i32_0 = arith.constant 0 : i32
    return %arg0, %c0_i32 : i32, i32
  }
  func.func @transform_3(%arg0: i32) -> (i32, i32) {
    %c0_i32 = arith.constant 0 : i32
    %c0_i32_0 = arith.constant 0 : i32
    return %arg0, %c0_i32 : i32, i32
  }
  func.func @transform_4(%arg0: i32) -> (i32, i32) {
    %c0_i32 = arith.constant 0 : i32
    %c0_i32_0 = arith.constant 0 : i32
    %c0_i32_1 = arith.constant 0 : i32
    return %c0_i32, %c0_i32_0 : i32, i32
  }
  func.func @transform_5(%arg0: i32) -> (i32, i32) {
    %c0_i32 = arith.constant 0 : i32
    %c0_i32_0 = arith.constant 0 : i32
    %c0_i32_1 = arith.constant 0 : i32
    return %c0_i32, %c0_i32_0 : i32, i32
  }
  func.func @transform_6(%arg0: i32) -> (i32, i32) {
    %c0_i32 = arith.constant 0 : i32
    %c0_i32_0 = arith.constant 0 : i32
    return %arg0, %c0_i32 : i32, i32
  }
}

</mosaic_0001>

<bundles_post_ra>
// kernel: tpu_custom_call.1
= control target key start
LH: loop header
LB: loop body
LE: loop exit
PB: predicated region body
PF: predicated region fallthrough
CT: control target
= control target key end

     0   :  { %11 = vsyncpa [#allocation3], 0  ;;  %s1317_s0 = inlined_call_operand.vmem [shape: f32[8,32], index: 0, kind: input, shape index: {}]   ;;  %s1318_s1 = inlined_call_operand.hbm [shape: f32[8,32], index: 1, kind: input, shape index: {}]   ;;  %s1319_s2 = inlined_call_operand.vmem [shape: f32[8,4], index: 2, kind: input, shape index: {}]   ;;  %s1320_s3 = inlined_call_operand.hbm [shape: f32[8,16], index: 3, kind: input, shape index: {}]   ;;  %s1321_s4 = inlined_call_operand.hbm [shape: bf16[32,1280], index: 4, kind: input, shape index: {}]   ;;  %s1322_s5 = inlined_call_operand.vmem [shape: f32[1,128], index: 5, kind: input, shape index: {}]   ;;  %s1323_s6 = inlined_call_operand.hbm [shape: f32[8,128], index: 6, kind: output, shape index: {}]  }
   0x1   :  { %12 = vsyncpa [#allocation6], 0  ;;  %s34_s23 = sshll.u32 %s1320_s3, 4  ;;  %s35_s23 = int_to_ptr.hbm [resolvable:$true] %s34_s23 }
   0x2   :  { %13 = vsyncpa [#allocation4], 0  ;;  %s1048_s24 = smov [#allocation5]   ;;  %s21_s28 = sshll.u32 %s1318_s1, 4  ;;  %s22_s28 = int_to_ptr.hbm [resolvable:$true] %s21_s28 }
   0x3   :  { %s36_s25 = sshll.u32 %s1048_s24, 4  ;;  %s1049_s29 = smov [#allocation2]   ;;  %s37_s25 = int_to_ptr.vmem [resolvable:$true] %s36_s25 }
   0x4   :  { %39 = dma.hbm_to_vmem [thread:$0]  %s35_s23, 128, %s37_s25, [#allocation6]  }
   0x5   :  { %s23_s30 = sshll.u32 %s1049_s29, 4  ;;  %s44_s9 = sshll.u32 %s1321_s4, 4  ;;  %s24_s30 = int_to_ptr.vmem [resolvable:$true] %s23_s30  ;;  %s45_s9 = int_to_ptr.hbm [resolvable:$true] %s44_s9 }
   0x6   :  { %26 = dma.hbm_to_vmem [thread:$0]  %s22_s28, 128, %s24_s30, [#allocation3]  }
   0x7   :  { %s1050_s3 = smov [#allocation7]   ;;  %s1051_s11 = smov 640  }
   0x8   :  { %s46_s10 = sshll.u32 %s1050_s3, 4  ;;  %s1052_s12 = smov 40   ;;  %s47_s10 = int_to_ptr.vmem [resolvable:$true] %s46_s10 }
   0x9   :  { %52 = dma.hbm_to_vmem [thread:$0]  %s45_s9, 2560, %s47_s10, [#allocation6], %s1051_s11, %s1051_s11, %s1052_s12  }
   0xa   :  { %1042 = dma.done.wait [#allocation3], 128  }
   0xb   :  { %1043 = vsyncadd [#allocation3], 4294967168 }
   0xc   :  { %1044 = dma.done.wait [#allocation6], 2688  }
   0xd   :  { %1045 = vsyncadd [#allocation6], 4294964608  ;;  %vm104_vm0 = vcmask 31744   ;;  %vm93_vm1 = vcmask 261120   ;;  %v1129_v0 = vld [vmem:[%s1319_s2] sm:$0xff]  ;;  %v1139_v4 = vld [vmem:[#allocation5] sm:$0xff] }
   0xe   :  { %v1134_v1 = vld [vmem:[%s1317_s0] sm:$0xff]  ;;  %v105_v2 = vsel %vm104_vm0, %v1129_v0, -inf  ;;  %vm110_vm2 = vcmask 130048   ;;  %v861_v9 = vld [vmem:[#allocation7 + $0x74] sm:$0xf0]  ;;  %v1053_v28 = vmov 2  }
   0xf   :  { %v94_v3 = vsel %vm93_vm1, %v1134_v1, -inf  ;;  %106 = vmax.xlane.f32.xlu1 %v105_v2  ;;  %v1141_v5 = vld [vmem:[#allocation2] sm:$0xff]  ;;  %v111_v6 = vsel %vm110_vm2, %v1139_v4, -inf  ;;  %v800_v12 = vld [vmem:[#allocation7 + $0x78] sm:$0xf0]  ;;  %v1054_v29 = vmov 1  }
  0x10   :  { %95 = vmax.xlane.f32.xlu0 %v94_v3  ;;  %v99_v7 = vsel %vm93_vm1, %v1141_v5, -inf  ;;  %v798_v8 = vld [vmem:[#allocation7 + $0x50] sm:$0xf]  ;;  %v856_v10 = vld [vmem:[#allocation7 + $0x54] sm:$0xf]  ;;  %902 = vset.pattern.permute.xlu1 %v1053_v28  ;;  %v1055_v37 = vmov 0  }
  0x11   :  { %v799_v11 = vor.u32 %v861_v9, %v798_v8  ;;  %v806_v13 = vld [vmem:[#allocation7 + $0x58] sm:$0xf]  ;;  %v862_v14 = vld [vmem:[#allocation7 + $0x7c] sm:$0xf0]  ;;  %v803_v15 = vor.u32 %v856_v10, %v800_v12  ;;  %v857_v17 = vld [vmem:[#allocation7 + $0x5c] sm:$0xf]  ;;  %901 = vset.pattern.permute.xlu0 %v1054_v29  ;;  %900 = vset.pattern.permute.xlu2 %v1055_v37 }
  0x12   :  { %v807_v16 = vor.u32 %v862_v14, %v806_v13  ;;  %v808_v18 = vld [vmem:[#allocation7 + $0x80] sm:$0xf0]  ;;  %v758_v20 = vld [vmem:[#allocation7] sm:$0xf]  ;;  %v851_v21 = vld [vmem:[#allocation7 + $0x24] sm:$0xf0] }
  0x13   :  { %238 = vmatpush.bf16.msra.mxu0 %v799_v11  ;;  %v811_v19 = vor.u32 %v857_v17, %v808_v18  ;;  %251 = vmatpush.bf16.msra.mxu1 %v803_v15  ;;  %v759_v22 = vor.u32 %v851_v21, %v758_v20  ;;  %v846_v23 = vld [vmem:[#allocation7 + $0x4] sm:$0xf]  ;;  %v760_v24 = vld [vmem:[#allocation7 + $0x28] sm:$0xf0]  ;;  %v766_v26 = vld [vmem:[#allocation7 + $0x8] sm:$0xf] }
  0x14   :  { %264 = vmatpush.bf16.msra.mxu2 %v807_v16  ;;  %v763_v25 = vor.u32 %v846_v23, %v760_v24  ;;  %v852_v27 = vld [vmem:[#allocation7 + $0x2c] sm:$0xf0]  ;;  %v847_v31 = vld [vmem:[#allocation7 + $0xc] sm:$0xf]  ;;  %v768_v32 = vld [vmem:[#allocation7 + $0x30] sm:$0xf0] }
  0x15   :  { %277 = vmatpush.bf16.msra.mxu3 %v811_v19  ;;  %v767_v30 = vor.u32 %v852_v27, %v766_v26  ;;  %v771_v33 = vor.u32 %v847_v31, %v768_v32  ;;  %v814_v34 = vld [vmem:[#allocation7 + $0x60] sm:$0xf]  ;;  %v863_v35 = vld [vmem:[#allocation7 + $0x84] sm:$0xf0]  ;;  %v858_v36 = vld [vmem:[#allocation7 + $0x64] sm:$0xf] }
  0x16   :  { %v815_v38 = vor.u32 %v863_v35, %v814_v34  ;;  %v816_v39 = vld [vmem:[#allocation7 + $0x88] sm:$0xf0]  ;;  %v822_v40 = vld [vmem:[#allocation7 + $0x68] sm:$0xf]  ;;  %v864_v41 = vld [vmem:[#allocation7 + $0x8c] sm:$0xf0] }
  0x17   :  { %112 = vmax.xlane.f32.xlu1 %v111_v6  ;;  %239 = vmatpush.bf16.msra.mxu0 %v759_v22  ;;  %v819_v42 = vor.u32 %v858_v36, %v816_v39  ;;  %v823_v43 = vor.u32 %v864_v41, %v822_v40  ;;  %v859_v44 = vld [vmem:[#allocation7 + $0x6c] sm:$0xf]  ;;  %v824_v45 = vld [vmem:[#allocation7 + $0x90] sm:$0xf0]  ;;  %v774_v46 = vld [vmem:[#allocation7 + $0x10] sm:$0xf] }
  0x18   :  { %100 = vmax.xlane.f32.xlu0 %v99_v7  ;;  %252 = vmatpush.bf16.msra.mxu1 %v763_v25  ;;  %v827_v47 = vor.u32 %v859_v44, %v824_v45  ;;  %v853_v48 = vld [vmem:[#allocation7 + $0x34] sm:$0xf0]  ;;  %v848_v49 = vld [vmem:[#allocation7 + $0x14] sm:$0xf]  ;;  %v776_v50 = vld [vmem:[#allocation7 + $0x38] sm:$0xf0] }
  0x19   :  { %265 = vmatpush.bf16.msra.mxu2 %v767_v30  ;;  %278 = vmatpush.bf16.msra.mxu3 %v771_v33  ;;  %v775_v51 = vor.u32 %v853_v48, %v774_v46  ;;  %v779_v52 = vor.u32 %v848_v49, %v776_v50  ;;  %v782_v53 = vld [vmem:[#allocation7 + $0x18] sm:$0xf]  ;;  %v854_v54 = vld [vmem:[#allocation7 + $0x3c] sm:$0xf0]  ;;  %v849_v55 = vld [vmem:[#allocation7 + $0x1c] sm:$0xf] }
  0x1a   :  { %v783_v56 = vor.u32 %v854_v54, %v782_v53  ;;  %v784_v57 = vld [vmem:[#allocation7 + $0x40] sm:$0xf0]  ;;  %vm723_vm5 = vcmask 523264   ;;  %vm725_vm7 = vcmask 785408   ;;  %v830_v13 = vld [vmem:[#allocation7 + $0x70] sm:$0xf] }
  0x1b   :  { %290 = vmatpush.bf16.msrb.mxu0 %v815_v38  ;;  %v787_v58 = vor.u32 %v849_v55, %v784_v57  ;;  %v865_v14 = vld [vmem:[#allocation7 + $0x94] sm:$0xf0]  ;;  %v860_v15 = vld [vmem:[#allocation7 + $0x74] sm:$0xf]  ;;  %v832_v16 = vld [vmem:[#allocation7 + $0x98] sm:$0xf0] }
  0x1c   :  { %303 = vmatpush.bf16.msrb.mxu1 %v819_v42  ;;  %v835_v23 = vor.u32 %v860_v15, %v832_v16  ;;  %v855_v24 = vld [vmem:[#allocation7 + $0x44] sm:$0xf0]  ;;  %v850_v25 = vld [vmem:[#allocation7 + $0x24] sm:$0xf]  ;;  %v792_v26 = vld [vmem:[#allocation7 + $0x48] sm:$0xf0] }
  0x1d   :  { %316 = vmatpush.bf16.msrb.mxu2 %v823_v43  ;;  %329 = vmatpush.bf16.msrb.mxu3 %v827_v47  ;;  %v795_v30 = vor.u32 %v850_v25, %v792_v26  ;;  %s1056_s0 = smov 127   ;;  %v1057_v33 = vmov 4   ;;  %v1058_v34 = vmov 5   ;;  %v1059_v35 = vmov 3   ;;  %s1076_s2 = smov 96  }
  0x1e   :  { %v1060_v36 = vmov 7   ;;  %v1061_v38 = vmov 10   ;;  %v1062_v39 = vmov 9   ;;  %v1063_v40 = vmov 15   ;;  %s1079_s15 = smov 64   ;;  %s1080_s16 = smov 32  }
  0x1f   :  { %291 = vmatpush.bf16.msrb.mxu0 %v775_v51  ;;  %v1064_v41 = vmov 12   ;;  %v1065_v42 = vmov 6   ;;  %v1067_v43 = vmov 8   ;;  %v1068_v44 = vmov 11   ;;  %s1081_s19 = smov [#allocation8]   ;;  %s745_s23 = sshll.u32 %s1323_s6, 4  ;;  %s746_s23 = int_to_ptr.hbm [resolvable:$true] %s745_s23 }
  0x20   :  { %304 = vmatpush.bf16.msrb.mxu1 %v779_v52  ;;  %v1069_v45 = vmov 13   ;;  %v1070_v49 = vmov 26   ;;  %v1071_v50 = vmov 30   ;;  %v1072_v51 = vmov 22   ;;  %s743_s20 = sshll.u32 %s1081_s19, 4  ;;  %s744_s20 = int_to_ptr.vmem [resolvable:$true] %s743_s20 }
  0x21   :  { %317 = vmatpush.bf16.msrb.mxu2 %v783_v56  ;;  %330 = vmatpush.bf16.msrb.mxu3 %v787_v58 }
  0x82   :  { %v107_v59 = vpop.xlane.xlu1 %106 }
  0x83   :  { %v96_v60 = vpop.xlane.xlu0 %95  ;;  %vm108_vm3 = vcmp.gt.f32.partialorder %v107_v59, -inf }
  0x84   :  { %vm97_vm4 = vcmp.gt.f32.partialorder %v96_v60, -inf  ;;  %v109_v61 = vsel %vm108_vm3, %v107_v59, 0.0 }
  0x85   :  { %v98_v62 = vsel %vm97_vm4, %v96_v60, 0.0  ;;  %v123_v63 = vsub.f32 %v1129_v0, %v109_v61  ;;  %v1073_v60 = vmov 18  }
  0x86   :  { %v116_v2 = vsub.f32 %v1134_v1, %v98_v62 }
  0x87   :  { %v124_v3 = vmul.f32 1.442695, %v123_v63 }
  0x88   :  { %v117_v6 = vmul.f32 1.442695, %v116_v2 }
  0x89   :  { %936 = vpow2.f32 %v124_v3 }
  0x8a   :  { %938 = vpow2.f32 %v117_v6  ;;  %v113_v7 = vpop.xlane.xlu1 %112 }
  0x8b   :  { %v101_v8 = vpop.xlane.xlu0 %100  ;;  %vm114_vm6 = vcmp.gt.f32.partialorder %v113_v7, -inf }
  0x8c   :  { %vm102_vm8 = vcmp.gt.f32.partialorder %v101_v8, -inf  ;;  %v115_v9 = vsel %vm114_vm6, %v113_v7, 0.0 }
  0x8d   :  { %v103_v10 = vsel %vm102_vm8, %v101_v8, 0.0  ;;  %v126_v11 = vsub.f32 %v1139_v4, %v115_v9  ;;  %v727_v12 = vsel %vm723_vm5, %v109_v61, %v115_v9  ;;  %v831_v4 = vor.u32 %v865_v14, %v830_v13 }
  0x8e   :  { %v120_v0 = vsub.f32 %v1141_v5, %v103_v10  ;;  %v728_v1 = vsel %vm725_vm7, %v727_v12, %v103_v10  ;;  %v790_v5 = vld [vmem:[#allocation7 + $0x20] sm:$0xf]  ;;  %v1074_v13 = vmov 20  }
  0x8f   :  { %v937_v17 = vpop.eup %936  ;;  %v127_v18 = vmul.f32 1.442695, %v126_v11  ;;  %v1155_v20 = vadd.f32 %v728_v1, %v98_v62  ;;  %v791_v27 = vor.u32 %v855_v24, %v790_v5  ;;  %v1075_v1 = vmov 28  }
  0x90   :  { %v121_v19 = vmul.f32 1.442695, %v120_v0  ;;  %v939_v21 = vpop.eup %938  ;;  %379 = vperm.xlu1 %902, %v937_v17   ;;  %374 = vperm.xlu0 %901, %v937_v17  }
  0x91   :  { %v119_v22 = vpack.c.bf16 %v939_v21, %v939_v21  ;;  %940 = vpow2.f32 %v127_v18 }
  0x92   :  { %942 = vpow2.f32 %v121_v19 }
  0x93   :  { %836 = vmatmul.msk.bf16.vlgmr.msra.gmra.mxu0 %vm93_vm1, %v119_v22  ;;  %837 = vmatmul.msk.bf16.vlgmr.msra.gmra.mxu1 %vm93_vm1, %v119_v22 }
  0x94   :  { %838 = vmatmul.msk.bf16.vlgmr.msra.gmra.mxu2 %vm93_vm1, %v119_v22  ;;  %839 = vmatmul.msk.bf16.vlgmr.msra.gmra.mxu3 %vm93_vm1, %v119_v22 }
  0x95   :  { %342 = vmatpush.bf16.msra.mxu0 %v831_v4  ;;  %355 = vmatpush.bf16.msra.mxu1 %v835_v23 }
  0x97   :  { %v941_v31 = vpop.eup %940 }
  0x98   :  { %v943_v32 = vpop.eup %942  ;;  %434 = vperm.xlu1 %902, %v941_v31   ;;  %904 = vset.pattern.permute.xlu0 %v1055_v37 }
  0x99   :  { %363 = vrot.lane.b32.xlu2 %v943_v32, %s1056_s0  ;;  %424 = vperm.xlu0 %904, %v941_v31  }
  0x9a   :  { %343 = vmatpush.bf16.msra.mxu0 %v791_v27  ;;  %356 = vmatpush.bf16.msra.mxu1 %v795_v30 }
  0xa0   :  { %907 = vset.pattern.permute.xlu1 %v1057_v33 }
  0xa1   :  { %369 = vperm.xlu2 %900, %v937_v17   ;;  %444 = vperm.xlu1 %907, %v941_v31  }
  0xa2   :  { %908 = vset.pattern.permute.xlu0 %v1058_v34 }
  0xa3   :  { %449 = vperm.xlu0 %908, %v941_v31   ;;  %840 = vmatmul.msk.bf16.vlgmr.msrb.gmra.mxu0 %vm93_vm1, %v119_v22 }
  0xa4   :  { %841 = vmatmul.msk.bf16.vlgmr.msrb.gmra.mxu1 %vm93_vm1, %v119_v22  ;;  %842 = vmatmul.msk.bf16.vlgmr.msrb.gmra.mxu2 %vm93_vm1, %v119_v22 }
  0xa5   :  { %843 = vmatmul.msk.bf16.vlgmr.msrb.gmra.mxu3 %vm93_vm1, %v119_v22 }
  0xa9   :  { %903 = vset.pattern.permute.xlu2 %v1059_v35  ;;  %910 = vset.pattern.permute.xlu1 %v1060_v36 }
  0xaa   :  { %384 = vperm.xlu2 %903, %v937_v17   ;;  %459 = vperm.xlu1 %910, %v941_v31  }
  0xab   :  { %913 = vset.pattern.permute.xlu0 %v1061_v38 }
  0xac   :  { %474 = vperm.xlu0 %913, %v941_v31  }
  0xb2   :  { %905 = vset.pattern.permute.xlu2 %v1054_v29  ;;  %912 = vset.pattern.permute.xlu1 %v1062_v39  ;;  %v1066_v29 = vmov 14  }
  0xb3   :  { %844 = vmatmul.msk.bf16.vlgmr.msra.gmra.mxu0 %vm93_vm1, %v119_v22  ;;  %429 = vperm.xlu2 %905, %v941_v31  }
  0xb4   :  { %845 = vmatmul.msk.bf16.vlgmr.msra.gmra.mxu1 %vm93_vm1, %v119_v22  ;;  %469 = vperm.xlu1 %912, %v941_v31  }
  0xb5   :  { %918 = vset.pattern.permute.xlu0 %v1063_v40 }
  0xb6   :  { %499 = vperm.xlu0 %918, %v941_v31  }
  0xbb   :  { %906 = vset.pattern.permute.xlu2 %v1059_v35 }
  0xbc   :  { %915 = vset.pattern.permute.xlu1 %v1064_v41  ;;  %439 = vperm.xlu2 %906, %v941_v31  }
  0xbd   :  { %484 = vperm.xlu1 %915, %v941_v31  }
  0xbe   :  { %923 = vset.pattern.permute.xlu0 %v1057_v33 }
  0xc4   :  { %909 = vset.pattern.permute.xlu2 %v1065_v42 }
  0xc5   :  { %917 = vset.pattern.permute.xlu1 %v1066_v29  ;;  %454 = vperm.xlu2 %909, %v941_v31  }
  0xc6   :  { %494 = vperm.xlu1 %917, %v941_v31  }
  0xcd   :  { %911 = vset.pattern.permute.xlu2 %v1067_v43 }
  0xce   :  { %464 = vperm.xlu2 %911, %v941_v31  }
  0xd6   :  { %914 = vset.pattern.permute.xlu2 %v1068_v44 }
  0xd7   :  { %479 = vperm.xlu2 %914, %v941_v31  }
  0xdf   :  { %916 = vset.pattern.permute.xlu2 %v1069_v45 }
  0xe0   :  { %489 = vperm.xlu2 %916, %v941_v31  }
  0xe8   :  { %919 = vset.pattern.permute.xlu2 %v1065_v42 }
  0xf3   :  { %v364_v46 = vpop.permute.xlu2 %363 }
  0xf4   :  { %v1170_v47 = vadd.f32 %v943_v32, %v364_v46 }
  0xf6   :  { %578 = vperm.xlu0 %923, %v1170_v47   ;;  %603 = vperm.xlu1 %917, %v1170_v47  }
  0xf7   :  { %583 = vperm.xlu2 %919, %v1170_v47  }
  0xfb   :  { %v370_v48 = vpop.permute.xlu2 %369 }
  0xfe   :  { %928 = vset.pattern.permute.xlu0 %v1070_v49  ;;  %921 = vset.pattern.permute.xlu1 %v1071_v50 }
  0xff   :  { %920 = vset.pattern.permute.xlu2 %v1072_v51  ;;  %633 = vperm.xlu0 %928, %v1170_v47  }
 0x100   :  { %643 = vperm.xlu1 %921, %v1170_v47   ;;  %623 = vperm.xlu2 %920, %v1170_v47  }
 0x102   :  { %v380_v52 = vpop.permute.xlu1 %379  ;;  %v375_v53 = vpop.permute.xlu0 %374 }
 0x104   :  { %v1179_v54 = vpop.permute.xlu2 %384 }
 0x107   :  { %930 = vset.pattern.permute.xlu0 %v1055_v37 }
 0x108   :  { %922 = vset.pattern.permute.xlu1 %v1053_v28  ;;  %924 = vset.pattern.permute.xlu2 %v1061_v38 }
 0x109   :  { %573 = vperm.xlu1 %922, %v1170_v47   ;;  %593 = vperm.xlu2 %924, %v1170_v47  }
 0x10a   :  { %v435_v55 = vpop.permute.xlu1 %434 }
 0x10b   :  { %v425_v56 = vpop.permute.xlu0 %424 }
 0x10d   :  { %v430_v57 = vpop.permute.xlu2 %429 }
 0x110   :  { %v241_v58 = vpop.f32.mrf.mxu0  ;;  %v1185_v59 = vpop.f32.mrf.mxu1 }
 0x111   :  { %925 = vset.pattern.permute.xlu1 %v1064_v41  ;;  %926 = vset.pattern.permute.xlu2 %v1073_v60  ;;  %v1189_v37 = vmul.f32 %v370_v48, %v241_v58  ;;  %v1191_v28 = vmul.f32 %v380_v52, %v241_v58  ;;  %v1194_v62 = vmul.f32 %v380_v52, %v1185_v59  ;;  %v1077_v52 = vmov 16  }
 0x112   :  { %598 = vperm.xlu1 %925, %v1170_v47   ;;  %613 = vperm.xlu2 %926, %v1170_v47   ;;  %v1197_v63 = vmul.f32 %v370_v48, %v1185_v59  ;;  %v404_v23 = vmul.f32 %v375_v53, %v1185_v59  ;;  %v377_v24 = vmul.f32 %v375_v53, %v241_v58 }
 0x113   :  { %v445_v61 = vpop.permute.xlu1 %444  ;;  %v387_v34 = vmul.f32 %v1179_v54, %v241_v58 }
 0x115   :  { %v450_v2 = vpop.permute.xlu0 %449 }
 0x116   :  { %v440_v3 = vpop.permute.xlu2 %439 }
 0x117   :  { %v267_v6 = vpop.f32.mrf.mxu2  ;;  %v280_v7 = vpop.f32.mrf.mxu3 }
 0x118   :  { %v243_v8 = vpop.f32.mrf.mxu0  ;;  %v256_v9 = vpop.f32.mrf.mxu1  ;;  %v432_v10 = vmul.f32 %v430_v57, %v267_v6  ;;  %v1199_v11 = vmul.f32 %v425_v56, %v267_v6  ;;  %v1201_v12 = vmul.f32 %v435_v55, %v267_v6  ;;  %v1203_v0 = vmul.f32 %v445_v61, %v280_v7 }
 0x119   :  { %v452_v30 = vmul.f32 %v450_v2, %v280_v7  ;;  %v442_v51 = vmul.f32 %v440_v3, %v267_v6  ;;  %v1078_v61 = vmov 24  }
 0x11a   :  { %927 = vset.pattern.permute.xlu1 %v1074_v13  ;;  %929 = vset.pattern.permute.xlu2 %v1075_v1 }
 0x11b   :  { %504 = vrot.lane.b32.xlu0 %v432_v10, %s1076_s2  ;;  %618 = vperm.xlu1 %927, %v1170_v47  }
 0x11c   :  { %638 = vperm.xlu2 %929, %v1170_v47   ;;  %v460_v14 = vpop.permute.xlu1 %459 }
 0x11d   :  { %v462_v16 = vmul.f32 %v460_v14, %v280_v7 }
 0x11e   :  { %v475_v15 = vpop.permute.xlu0 %474 }
 0x11f   :  { %v269_v17 = vpop.f32.mrf.mxu2  ;;  %v282_v18 = vpop.f32.mrf.mxu3 }
 0x120   :  { %v455_v19 = vpop.permute.xlu2 %454  ;;  %v293_v21 = vpop.f32.mrf.mxu0 }
 0x121   :  { %v1208_v22 = vmul.f32 %v455_v19, %v280_v7  ;;  %v1210_v4 = vpop.f32.mrf.mxu1  ;;  %v1213_v5 = vmul.f32 %v475_v15, %v293_v21 }
 0x123   :  { %519 = vrot.lane.b32.xlu0 %v462_v16, %s1076_s2  ;;  %408 = vrot.lane.b32.xlu1 %v404_v23, %s1076_s2 }
 0x124   :  { %389 = vrot.lane.b32.xlu2 %v377_v24, %s1076_s2  ;;  %932 = vset.pattern.permute.xlu1 %v1077_v52 }
 0x125   :  { %931 = vset.pattern.permute.xlu2 %v1067_v43  ;;  %v406_v43 = vmul.f32 %v1179_v54, %v1185_v59 }
 0x126   :  { %v470_v25 = vpop.permute.xlu1 %469 }
 0x127   :  { %v1219_v26 = vpop.f32.mrf.mxu2  ;;  %v472_v53 = vmul.f32 %v470_v25, %v293_v21 }
 0x128   :  { %v1221_v27 = vpop.f32.mrf.mxu3  ;;  %v295_v31 = vpop.f32.mrf.mxu0 }
 0x129   :  { %v308_v32 = vpop.f32.mrf.mxu1  ;;  %v465_v33 = vpop.permute.xlu2 %464 }
 0x12a   :  { %v1224_v35 = vmul.f32 %v465_v33, %v293_v21  ;;  %v500_v54 = vpop.permute.xlu0 %499 }
 0x12b   :  { %514 = vrot.lane.b32.xlu1 %v452_v30, %s1076_s2  ;;  %v502_v56 = vmul.f32 %v500_v54, %v1210_v4 }
 0x12c   :  { %394 = vrot.lane.b32.xlu2 %v387_v34, %s1076_s2 }
 0x12f   :  { %v321_v36 = vpop.f32.mrf.mxu2  ;;  %v485_v38 = vpop.permute.xlu1 %484 }
 0x130   :  { %v334_v39 = vpop.f32.mrf.mxu3  ;;  %v1229_v40 = vmul.f32 %v485_v38, %v1210_v4  ;;  %v1231_v41 = vpop.f32.mrf.mxu0 }
 0x131   :  { %v1233_v42 = vpop.f32.mrf.mxu1  ;;  %v480_v29 = vpop.permute.xlu2 %479 }
 0x132   :  { %v482_v44 = vmul.f32 %v480_v29, %v293_v21 }
 0x134   :  { %413 = vrot.lane.b32.xlu2 %v406_v43, %s1076_s2  ;;  %529 = vrot.lane.b32.xlu1 %v482_v44, %s1076_s2 }
 0x138   :  { %v495_v45 = vpop.permute.xlu1 %494  ;;  %v347_v48 = vpop.f32.mrf.mxu0 }
 0x139   :  { %v1240_v46 = vmul.f32 %v495_v45, %v1210_v4  ;;  %v360_v49 = vpop.f32.mrf.mxu1 }
 0x13a   :  { %v490_v55 = vpop.permute.xlu2 %489 }
 0x13b   :  { %v492_v14 = vmul.f32 %v490_v55, %v1210_v4 }
 0x13c   :  { %509 = vrot.lane.b32.xlu2 %v442_v51, %s1076_s2 }
 0x144   :  { %524 = vrot.lane.b32.xlu2 %v472_v53, %s1076_s2 }
 0x14c   :  { %539 = vrot.lane.b32.xlu2 %v502_v56, %s1076_s2 }
 0x151   :  { %v584_v57 = vpop.permute.xlu2 %583 }
 0x152   :  { %v586_v58 = vmul.f32 %v584_v57, %v1219_v26 }
 0x154   :  { %588 = vperm.xlu2 %931, %v1170_v47   ;;  %653 = vrot.lane.b32.xlu1 %v586_v58, %s1076_s2 }
 0x15a   :  { %v624_v59 = vpop.permute.xlu2 %623 }
 0x15b   :  { %v626_v60 = vmul.f32 %v624_v59, %v1231_v41 }
 0x15c   :  { %608 = vperm.xlu1 %932, %v1170_v47   ;;  %933 = vset.pattern.permute.xlu2 %v1078_v61 }
 0x15d   :  { %673 = vrot.lane.b32.xlu2 %v626_v60, %s1076_s2 }
 0x163   :  { %v594_v2 = vpop.permute.xlu2 %593 }
 0x164   :  { %v596_v7 = vmul.f32 %v594_v2, %v1221_v27 }
 0x165   :  { %628 = vperm.xlu2 %933, %v1170_v47  }
 0x168   :  { %v604_v3 = vpop.permute.xlu1 %603  ;;  %v579_v1 = vpop.permute.xlu0 %578 }
 0x169   :  { %v606_v6 = vmul.f32 %v604_v3, %v1221_v27 }
 0x16b   :  { %663 = vrot.lane.b32.xlu0 %v606_v6, %s1076_s2 }
 0x16c   :  { %v614_v8 = vpop.permute.xlu2 %613 }
 0x16d   :  { %658 = vrot.lane.b32.xlu2 %v596_v7, %s1076_s2  ;;  %v616_v19 = vmul.f32 %v614_v8, %v1231_v41 }
 0x172   :  { %v644_v9 = vpop.permute.xlu1 %643 }
 0x173   :  { %v646_v10 = vmul.f32 %v644_v9, %v1233_v42  ;;  %568 = vperm.xlu0 %930, %v1170_v47   ;;  %v634_v47 = vpop.permute.xlu0 %633 }
 0x174   :  { %v636_v21 = vmul.f32 %v634_v47, %v1233_v42 }
 0x175   :  { %683 = vrot.lane.b32.xlu1 %v646_v10, %s1076_s2 }
 0x176   :  { %v1260_v13 = vpop.permute.xlu2 %638 }
 0x177   :  { %v641_v60 = vmul.f32 %v1260_v13, %v1233_v42 }
 0x17b   :  { %v574_v15 = vpop.permute.xlu1 %573  ;;  %934 = vset.pattern.permute.xlu0 %v1071_v50 }
 0x17c   :  { %v576_v16 = vmul.f32 %v574_v15, %v1219_v26 }
 0x17d   :  { %534 = vrot.lane.b32.xlu1 %v492_v14, %s1076_s2 }
 0x17e   :  { %v390_v17 = vpop.permute.xlu2 %389  ;;  %648 = vrot.lane.b32.xlu0 %v576_v16, %s1076_s2 }
 0x17f   :  { %v392_v18 = vadd.f32 %v390_v17, %v1189_v37 }
 0x184   :  { %v599_v23 = vpop.permute.xlu1 %598 }
 0x185   :  { %668 = vrot.lane.b32.xlu1 %v616_v19, %s1076_s2  ;;  %v601_v54 = vmul.f32 %v599_v23, %v1221_v27 }
 0x186   :  { %v395_v4 = vpop.permute.xlu2 %394  ;;  %678 = vrot.lane.b32.xlu0 %v636_v21, %s1076_s2 }
 0x187   :  { %v397_v50 = vadd.f32 %v395_v4, %v1191_v28 }
 0x189   :  { %399 = vrot.lane.b32.xlu2 %v397_v50, %s1079_s15 }
 0x18d   :  { %v505_v24 = vpop.permute.xlu0 %504  ;;  %v619_v25 = vpop.permute.xlu1 %618 }
 0x18e   :  { %v1275_v37 = vadd.f32 %v505_v24, %v1199_v11  ;;  %v414_v30 = vpop.permute.xlu2 %413 }
 0x18f   :  { %v416_v31 = vadd.f32 %v414_v30, %v1194_v62 }
 0x191   :  { %418 = vrot.lane.b32.xlu1 %v416_v31, %s1079_s15 }
 0x195   :  { %v520_v32 = vpop.permute.xlu0 %519  ;;  %v409_v33 = vpop.permute.xlu1 %408 }
 0x196   :  { %v522_v34 = vadd.f32 %v520_v32, %v1208_v22  ;;  %v411_v36 = vadd.f32 %v409_v33, %v1197_v63  ;;  %v510_v28 = vpop.permute.xlu2 %509 }
 0x197   :  { %v512_v38 = vadd.f32 %v510_v28, %v1201_v12  ;;  %v621_v12 = vmul.f32 %v619_v25, %v1231_v41 }
 0x199   :  { %544 = vrot.lane.b32.xlu2 %v512_v38, %s1079_s15  ;;  %549 = vrot.lane.b32.xlu1 %v522_v34, %s1079_s15 }
 0x19d   :  { %v515_v11 = vpop.permute.xlu1 %514 }
 0x19e   :  { %v525_v39 = vpop.permute.xlu2 %524  ;;  %v517_v29 = vadd.f32 %v515_v11, %v1203_v0 }
 0x19f   :  { %v527_v62 = vadd.f32 %v525_v39, %v1224_v35  ;;  %v581_v35 = vmul.f32 %v579_v1, %v1219_v26 }
 0x1a6   :  { %v540_v43 = vpop.permute.xlu2 %539  ;;  %v530_v45 = vpop.permute.xlu1 %529 }
 0x1a7   :  { %v542_v44 = vadd.f32 %v540_v43, %v1240_v46  ;;  %v532_v22 = vadd.f32 %v530_v45, %v1213_v5 }
 0x1a9   :  { %559 = vrot.lane.b32.xlu2 %v542_v44, %s1079_s15  ;;  %554 = vrot.lane.b32.xlu0 %v532_v22, %s1079_s15  ;;  %v935_v22 = vld [vmem:[%s1322_s5] ss:$0 sm:$0xff] }
 0x1ae   :  { %v589_v63 = vpop.permute.xlu2 %588 }
 0x1af   :  { %v591_v51 = vmul.f32 %v589_v63, %v1221_v27 }
 0x1b7   :  { %v674_v48 = vpop.permute.xlu2 %673 }
 0x1b8   :  { %v676_v49 = vadd.f32 %v674_v48, %v621_v12  ;;  %v733_v12 = vadd.f32 %v935_v22, %v1155_v20 }
 0x1ba   :  { %698 = vrot.lane.b32.xlu2 %v676_v49, %s1079_s15 }
 0x1bf   :  { %v629_v0 = vpop.permute.xlu2 %628 }
 0x1c0   :  { %v631_v10 = vmul.f32 %v629_v0, %v1233_v42 }
 0x1c6   :  { %v654_v46 = vpop.permute.xlu1 %653 }
 0x1c7   :  { %v656_v52 = vadd.f32 %v654_v46, %v581_v35  ;;  %v659_v53 = vpop.permute.xlu2 %658 }
 0x1c8   :  { %v661_v5 = vadd.f32 %v659_v53, %v591_v51 }
 0x1c9   :  { %688 = vrot.lane.b32.xlu1 %v656_v52, %s1079_s15 }
 0x1ce   :  { %v609_v57 = vpop.permute.xlu1 %608 }
 0x1cf   :  { %v611_v9 = vmul.f32 %v609_v57, %v1231_v41 }
 0x1dd   :  { %v664_v55 = vpop.permute.xlu0 %663 }
 0x1de   :  { %v666_v56 = vadd.f32 %v664_v55, %v601_v54 }
 0x1e0   :  { %693 = vrot.lane.b32.xlu0 %v666_v56, %s1079_s15 }
 0x1e3   :  { %v400_v58 = vpop.permute.xlu2 %399 }
 0x1e4   :  { %v402_v59 = vadd.f32 %v400_v58, %v392_v18 }
 0x1e5   :  { %v569_v2 = vpop.permute.xlu0 %568 }
 0x1e6   :  { %v571_v6 = vmul.f32 %v569_v2, %v1219_v26 }
 0x1e7   :  { %v684_v61 = vpop.permute.xlu1 %683 }
 0x1e8   :  { %v686_v3 = vadd.f32 %v684_v61, %v641_v60 }
 0x1ea   :  { %703 = vrot.lane.b32.xlu1 %v686_v3, %s1079_s15 }
 0x1ef   :  { %v535_v7 = vpop.permute.xlu1 %534 }
 0x1f0   :  { %v649_v8 = vpop.permute.xlu0 %648  ;;  %v537_v4 = vadd.f32 %v535_v7, %v1229_v40 }
 0x1f1   :  { %v651_v27 = vadd.f32 %v649_v8, %v571_v6 }
 0x1f3   :  { %v545_v18 = vpop.permute.xlu2 %544 }
 0x1f4   :  { %v547_v19 = vadd.f32 %v545_v18, %v1275_v37 }
 0x1f7   :  { %v669_v1 = vpop.permute.xlu1 %668 }
 0x1f8   :  { %v671_v14 = vadd.f32 %v669_v1, %v611_v9  ;;  %v679_v15 = vpop.permute.xlu0 %678 }
 0x1f9   :  { %v681_v16 = vadd.f32 %v679_v15, %v631_v10 }
 0x203   :  { %v419_v17 = vpop.permute.xlu1 %418  ;;  %v560_v23 = vpop.permute.xlu2 %559 }
 0x204   :  { %v421_v13 = vadd.f32 %v419_v17, %v411_v36  ;;  %v562_v50 = vadd.f32 %v560_v23, %v537_v4 }
 0x206   :  { %711 = vrot.lane.b32.xlu0 %v421_v13, %s1080_s16 }
 0x20b   :  { %v550_v47 = vpop.permute.xlu1 %549 }
 0x20c   :  { %v552_v26 = vadd.f32 %v550_v47, %v517_v29 }
 0x20e   :  { %v563_v21 = vadd.f32 %v552_v26, %v547_v19 }
 0x214   :  { %v699_v36 = vpop.permute.xlu2 %698 }
 0x215   :  { %v701_v37 = vadd.f32 %v699_v36, %v671_v14 }
 0x21b   :  { %v555_v41 = vpop.permute.xlu0 %554 }
 0x21c   :  { %v557_v42 = vadd.f32 %v555_v41, %v527_v62 }
 0x21e   :  { %v564_v24 = vadd.f32 %v562_v50, %v557_v42 }
 0x220   :  { %v565_v25 = vadd.f32 %v564_v24, %v563_v21 }
 0x222   :  { %715 = vrot.lane.b32.xlu2 %v565_v25, %s1079_s15 }
 0x23b   :  { %v689_v30 = vpop.permute.xlu1 %688 }
 0x23c   :  { %v691_v32 = vadd.f32 %v689_v30, %v651_v27 }
 0x252   :  { %v694_v31 = vpop.permute.xlu0 %693 }
 0x253   :  { %v696_v33 = vadd.f32 %v694_v31, %v661_v5 }
 0x255   :  { %v707_v34 = vadd.f32 %v696_v33, %v691_v32 }
 0x25c   :  { %v704_v28 = vpop.permute.xlu1 %703 }
 0x25d   :  { %v706_v38 = vadd.f32 %v704_v28, %v681_v16 }
 0x25f   :  { %v708_v11 = vadd.f32 %v706_v38, %v701_v37 }
 0x261   :  { %v709_v39 = vadd.f32 %v708_v11, %v707_v34 }
 0x263   :  { %719 = vrot.lane.b32.xlu1 %v709_v39, %s1076_s2 }
 0x278   :  { %v712_v40 = vpop.permute.xlu0 %711 }
 0x279   :  { %v722_v62 = vsel %vm93_vm1, %v402_v59, %v712_v40 }
 0x27c   :  { %v716_v29 = vpop.permute.xlu2 %715 }
 0x27d   :  { %v724_v43 = vsel %vm723_vm5, %v722_v62, %v716_v29 }
 0x2d5   :  { %v720_v44 = vpop.permute.xlu1 %719 }
 0x2d6   :  { %v726_v45 = vsel %vm725_vm7, %v724_v43, %v720_v44 }
 0x2d7   :  { %944 = vlog2.f32 %v726_v45 }
 0x2dd   :  { %v945_v63 = vpop.eup %944 }
 0x2de   :  { %v735_v48 = vmul.f32 0.6931472, %v945_v63 }
 0x2e0   :  { %v736_v49 = vadd.f32 %v735_v48, %v733_v12 }
 0x2e2   :  { %737 = vst [vmem:[#allocation8] sm:$0xff] %v736_v49 }
 0x2e3   :  { %748 = dma.vmem_to_hbm [thread:$0]  %s744_s20, 128, %s746_s23, [#allocation4]  }
 0x2e4   :  { %1046 = dma.done.wait [#allocation4], 128  }
 0x2e5   :  { %1047 = vsyncadd [#allocation4], 4294967168 }
 0x2e6   :  { %753 = vsyncpa [#allocation3], 1 }
 0x2e7   :  { %754 = vsyncpa [#allocation6], 1 }
 0x2e8   :  { %755 = vsyncpa [#allocation4], 1 }

</bundles_post_ra>
